<compile_context>
chip_gen: v5e
topology: v5e:2x2
jax: 0.10.0
libtpu: 0.0.40
codegen_flags: <defaults>
</compile_context>

<pallas_src>
import functools

import numpy as np
import jax
import jax.numpy as jnp
from jax.experimental import pallas as pl
from jax.experimental.pallas import tpu as pltpu


def _pick_spatial_tile(S: int, C: int, itemsize: int = 4) -> int:
    """Largest lane-dense (multiple-of-128) divisor of S that keeps one (C, tile)
    buffer comfortably inside VMEM; falls back to the full spatial extent
    (block == array dim is always legal)."""
    budget = 4 * 1024 * 1024  # bytes per block; double-buffered in+out stays well under 32 MiB
    max_t = max(128, budget // max(1, C * itemsize))
    for cand in (2048, 1024, 512, 256, 128):
        if cand <= max_t and S % cand == 0:
            return cand
    # TODO(synk): S with no 128-multiple divisor falls back to a single full-extent
    # spatial block instead of masked partial tiles.
    return S


def _pool_mlp_kernel(x_ref, w_enc_ref, w_dec_ref, att_ref, acc_ref, *, inv_s):
    """Global average pool (accumulated across spatial tiles) fused with the
    encoder -> ReLU -> decoder -> sigmoid MLP at the final tile."""
    t = pl.program_id(1)

    @pl.when(t == 0)
    def _():
        acc_ref[...] = jnp.zeros_like(acc_ref)

    x = x_ref[0].astype(jnp.float32)                    # (C, T)
    acc_ref[...] += jnp.sum(x, axis=1, keepdims=True)   # (C, 1) running spatial sum

    @pl.when(t == pl.num_programs(1) - 1)
    def _():
        mean = acc_ref[...] * inv_s                                              # (C, 1)
        z = jnp.dot(w_enc_ref[...], mean, preferred_element_type=jnp.float32)    # (Cr, 1)
        z = jnp.maximum(z, 0.0)                                                  # ReLU
        a = jnp.dot(w_dec_ref[...], z, preferred_element_type=jnp.float32)       # (C, 1)
        a = 1.0 / (1.0 + jnp.exp(-a))                                            # sigmoid
        att_ref[0] = a


def _scale_kernel(x_ref, att_ref, o_ref):
    """y = x * attention, attention broadcast along the (lane) spatial axis."""
    x = x_ref[...].astype(jnp.float32)                  # (1, C, T)
    o_ref[...] = (x * att_ref[...]).astype(o_ref.dtype)


def squeeze_and_excitation_nd(x, w_enc, w_dec):
    """Forward pass of SqueezeAndExcitationNd.

    Args:
      x:     (N, C, *spatial)  -- any number of spatial dims (dim = 1, 2 or 3).
      w_enc: (C // r, C)       -- PyTorch Linear(channels, channels // r).weight.
      w_dec: (C, C // r)       -- PyTorch Linear(channels // r, channels).weight.
    Returns:
      y with the same shape/dtype as x.
    """
    orig_shape = x.shape
    N, C = int(x.shape[0]), int(x.shape[1])
    S = int(np.prod(x.shape[2:]))
    Cr = int(w_enc.shape[0])

    x3 = x.reshape(N, C, S)
    T = _pick_spatial_tile(S, C, jnp.dtype(jnp.float32).itemsize)
    nt = S // T

    # ---- Kernel 1: fused global-average-pool + MLP + sigmoid -> attention (N, C, 1) ----
    att = pl.pallas_call(
        functools.partial(_pool_mlp_kernel, inv_s=1.0 / float(S)),
        out_shape=jax.ShapeDtypeStruct((N, C, 1), jnp.float32),
        grid_spec=pltpu.PrefetchScalarGridSpec(
            num_scalar_prefetch=0,
            grid=(N, nt),
            in_specs=[
                pl.BlockSpec((1, C, T), lambda n, t: (n, 0, t)),
                pl.BlockSpec((Cr, C), lambda n, t: (0, 0)),   # resident encoder weight
                pl.BlockSpec((C, Cr), lambda n, t: (0, 0)),   # resident decoder weight
            ],
            out_specs=pl.BlockSpec((1, C, 1), lambda n, t: (n, 0, 0)),
            scratch_shapes=[pltpu.VMEM((C, 1), jnp.float32)],
        ),
        compiler_params=pltpu.CompilerParams(
            dimension_semantics=("parallel", "arbitrary"),
            vmem_limit_bytes=32 * 1024 * 1024,
        ),
    )(x3, w_enc, w_dec)

    # ---- Kernel 2: channel-wise rescale y = x * attention ----
    y3 = pl.pallas_call(
        _scale_kernel,
        out_shape=jax.ShapeDtypeStruct((N, C, S), x.dtype),
        grid_spec=pltpu.PrefetchScalarGridSpec(
            num_scalar_prefetch=0,
            grid=(N, nt),
            in_specs=[
                pl.BlockSpec((1, C, T), lambda n, t: (n, 0, t)),
                pl.BlockSpec((1, C, 1), lambda n, t: (n, 0, 0)),
            ],
            out_specs=pl.BlockSpec((1, C, T), lambda n, t: (n, 0, t)),
        ),
        compiler_params=pltpu.CompilerParams(
            dimension_semantics=("parallel", "parallel"),
            vmem_limit_bytes=32 * 1024 * 1024,
        ),
    )(x3, att)

    return y3.reshape(orig_shape)


if __name__ == "__main__":
    key = jax.random.PRNGKey(0)
    k1, k2, k3 = jax.random.split(key, 3)

    # Small dim=2 example: N=2, C=16, reduction_factor=4, 64x64 spatial
    N, C, H, W = 2, 16, 64, 64
    reduction_factor = 4
    Cr = C // reduction_factor

    x = jax.random.normal(k1, (N, C, H, W), dtype=jnp.float32)
    w_enc = 0.1 * jax.random.normal(k2, (Cr, C), dtype=jnp.float32)   # Linear(C, C//r).weight
    w_dec = 0.1 * jax.random.normal(k3, (C, Cr), dtype=jnp.float32)   # Linear(C//r, C).weight

    y = squeeze_and_excitation_nd(x, w_enc, w_dec)
    y = jax.block_until_ready(y)

    # Pure-JAX reference of the PyTorch forward.
    pooled = jnp.mean(x.reshape(N, C, -1), axis=-1)          # (N, C)
    a_ref = jnp.maximum(pooled @ w_enc.T, 0.0)                # encoder + ReLU
    a_ref = jax.nn.sigmoid(a_ref @ w_dec.T)                   # decoder + sigmoid
    y_ref = x * a_ref[:, :, None, None]

    max_err = float(jnp.max(jnp.abs(y - y_ref)))
    assert np.allclose(np.asarray(y), np.asarray(y_ref), atol=1e-4, rtol=1e-4), max_err
    print("KERNEL_OK")
</pallas_src>

<mosaic_0001>
module attributes {stable_mosaic.version = 11 : i64} {
  func.func @_pool_mlp_kernel(%arg0: i32, %arg1: i32, %arg2: memref<1x16x2048xf32, #tpu.memory_space<vmem>>, %arg3: memref<4x16xf32, #tpu.memory_space<vmem>>, %arg4: memref<16x4xf32, #tpu.memory_space<vmem>>, %arg5: memref<1x16x1xf32, #tpu.memory_space<vmem>>, %arg6: memref<16x1xf32, #tpu.memory_space<vmem>>) attributes {dimension_semantics = [#tpu.dimension_semantics<parallel>, #tpu.dimension_semantics<arbitrary>], iteration_bounds = array<i64: 2, 2>, scalar_prefetch = 0 : i64, scratch_operands = 1 : i64, tpu.core_type = #tpu.core_type<tc>, window_params = [{transform_indices = @transform_0, window_bounds = array<i64: 1, 16, 2048>}, {pipeline_mode = #tpu.pipeline_mode<synchronous>, transform_indices = @transform_1, window_bounds = array<i64: 4, 16>}, {pipeline_mode = #tpu.pipeline_mode<synchronous>, transform_indices = @transform_2, window_bounds = array<i64: 16, 4>}, {transform_indices = @transform_3, window_bounds = array<i64: 1, 16, 1>}]} {
    %c0_i32 = arith.constant 0 : i32
    %0 = arith.cmpi eq, %arg1, %c0_i32 : i32
    %1 = arith.extui %0 : i1 to i32
    %c0_i32_0 = arith.constant 0 : i32
    %2 = arith.cmpi ne, %1, %c0_i32_0 : i32
    scf.if %2 {
      %cst_8 = arith.constant 0.000000e+00 : f32
      %13 = vector.broadcast %cst_8 : f32 to vector<16x1xf32>
      %c0_9 = arith.constant 0 : index
      %c0_10 = arith.constant 0 : index
      %14 = vector.load %arg6[%c0_9, %c0_10] : memref<16x1xf32, #tpu.memory_space<vmem>>, vector<16x1xf32>
      tpu.vector_store %arg6[%c0_9, %c0_10], %13 {strides = array<i32>} : memref<16x1xf32, #tpu.memory_space<vmem>>, vector<16x1xf32>,
    } else {
    }
    %c0 = arith.constant 0 : index
    %c0_1 = arith.constant 0 : index
    %c0_2 = arith.constant 0 : index
    %3 = vector.load %arg2[%c0, %c0_1, %c0_2] : memref<1x16x2048xf32, #tpu.memory_space<vmem>>, vector<1x16x2048xf32>
    %4 = vector.shape_cast %3 : vector<1x16x2048xf32> to vector<16x2048xf32>
    %c0_3 = arith.constant 0 : index
    %c0_4 = arith.constant 0 : index
    %5 = vector.load %arg6[%c0_3, %c0_4] : memref<16x1xf32, #tpu.memory_space<vmem>>, vector<16x1xf32>
    %cst = arith.constant dense<0.000000e+00> : vector<16xf32>
    %6 = vector.multi_reduction <add>, %4, %cst [1] : vector<16x2048xf32> to vector<16xf32>
    %7 = vector.shape_cast %6 : vector<16xf32> to vector<16x1xf32>
    %8 = arith.addf %5, %7 : vector<16x1xf32>
    %c0_5 = arith.constant 0 : index
    %c0_6 = arith.constant 0 : index
    %9 = vector.load %arg6[%c0_5, %c0_6] : memref<16x1xf32, #tpu.memory_space<vmem>>, vector<16x1xf32>
    tpu.vector_store %arg6[%c0_5, %c0_6], %8 {strides = array<i32>} : memref<16x1xf32, #tpu.memory_space<vmem>>, vector<16x1xf32>,
    %c1_i32 = arith.constant 1 : i32
    %10 = arith.cmpi eq, %arg1, %c1_i32 : i32
    %11 = arith.extui %10 : i1 to i32
    %c0_i32_7 = arith.constant 0 : i32
    %12 = arith.cmpi ne, %11, %c0_i32_7 : i32
    scf.if %12 {
      %c0_8 = arith.constant 0 : index
      %c0_9 = arith.constant 0 : index
      %13 = vector.load %arg6[%c0_8, %c0_9] : memref<16x1xf32, #tpu.memory_space<vmem>>, vector<16x1xf32>
      %cst_10 = arith.constant 2.44140625E-4 : f32
      %14 = vector.broadcast %cst_10 : f32 to vector<16x1xf32>
      %15 = arith.mulf %13, %14 : vector<16x1xf32>
      %c0_11 = arith.constant 0 : index
      %c0_12 = arith.constant 0 : index
      %16 = vector.load %arg3[%c0_11, %c0_12] : memref<4x16xf32, #tpu.memory_space<vmem>>, vector<4x16xf32>
      %cst_13 = arith.constant dense<0.000000e+00> : vector<4x1xf32>
      %17 = tpu.matmul %16, %15, %cst_13 {dimension_numbers = #tpu.dot_dimension_numbers<[1], [0], [0], [1], [0, 0, 1, 1], [], []>} : vector<4x16xf32>, vector<16x1xf32>, vector<4x1xf32> -> vector<4x1xf32>
      %cst_14 = arith.constant 0.000000e+00 : f32
      %18 = vector.broadcast %cst_14 : f32 to vector<4x1xf32>
      %19 = arith.maximumf %17, %18 : vector<4x1xf32>
      %c0_15 = arith.constant 0 : index
      %c0_16 = arith.constant 0 : index
      %20 = vector.load %arg4[%c0_15, %c0_16] : memref<16x4xf32, #tpu.memory_space<vmem>>, vector<16x4xf32>
      %cst_17 = arith.constant dense<0.000000e+00> : vector<16x1xf32>
      %21 = tpu.matmul %20, %19, %cst_17 {dimension_numbers = #tpu.dot_dimension_numbers<[1], [0], [0], [1], [0, 0, 1, 1], [], []>} : vector<16x4xf32>, vector<4x1xf32>, vector<16x1xf32> -> vector<16x1xf32>
      %cst_18 = arith.constant 0.000000e+00 : f32
      %22 = vector.broadcast %cst_18 : f32 to vector<16x1xf32>
      %23 = arith.subf %22, %21 : vector<16x1xf32>
      %24 = math.exp %23 : vector<16x1xf32>
      %cst_19 = arith.constant 1.000000e+00 : f32
      %25 = vector.broadcast %cst_19 : f32 to vector<16x1xf32>
      %26 = arith.addf %25, %24 : vector<16x1xf32>
      %cst_20 = arith.constant 1.000000e+00 : f32
      %27 = vector.broadcast %cst_20 : f32 to vector<16x1xf32>
      %28 = arith.divf %27, %26 : vector<16x1xf32>
      %c0_21 = arith.constant 0 : index
      %c0_22 = arith.constant 0 : index
      %c0_23 = arith.constant 0 : index
      %29 = vector.load %arg5[%c0_21, %c0_22, %c0_23] : memref<1x16x1xf32, #tpu.memory_space<vmem>>, vector<1x16x1xf32>
      %30 = vector.shape_cast %29 : vector<1x16x1xf32> to vector<16x1xf32>
      %31 = vector.shape_cast %28 : vector<16x1xf32> to vector<1x16x1xf32>
      tpu.vector_store %arg5[%c0_21, %c0_22, %c0_23], %31 {strides = array<i32>} : memref<1x16x1xf32, #tpu.memory_space<vmem>>, vector<1x16x1xf32>,
    } else {
    }
    return
  }
  func.func @transform_0(%arg0: i32, %arg1: i32) -> (i32, i32, i32) {
    %c0_i32 = arith.constant 0 : i32
    %c0_i32_0 = arith.constant 0 : i32
    return %arg0, %c0_i32, %arg1 : i32, i32, i32
  }
  func.func @transform_1(%arg0: i32, %arg1: i32) -> (i32, i32) {
    %c0_i32 = arith.constant 0 : i32
    %c0_i32_0 = arith.constant 0 : i32
    %c0_i32_1 = arith.constant 0 : i32
    return %c0_i32, %c0_i32_0 : i32, i32
  }
  func.func @transform_2(%arg0: i32, %arg1: i32) -> (i32, i32) {
    %c0_i32 = arith.constant 0 : i32
    %c0_i32_0 = arith.constant 0 : i32
    %c0_i32_1 = arith.constant 0 : i32
    return %c0_i32, %c0_i32_0 : i32, i32
  }
  func.func @transform_3(%arg0: i32, %arg1: i32) -> (i32, i32, i32) {
    %c0_i32 = arith.constant 0 : i32
    %c0_i32_0 = arith.constant 0 : i32
    %c0_i32_1 = arith.constant 0 : i32
    return %arg0, %c0_i32, %c0_i32_0 : i32, i32, i32
  }
}

</mosaic_0001>

<bundles_post_ra>
// kernel: tpu_custom_call.1
= control target key start
LH: loop header
LB: loop body
LE: loop exit
PB: predicated region body
PF: predicated region fallthrough
CT: control target
= control target key end

     0   :  { %8 = vsyncpa [#allocation4], 0  ;;  %s874_s0 = inlined_call_operand.hbm [shape: f32[2,16,4096], index: 0, kind: input, shape index: {}]   ;;  %s875_s1 = inlined_call_operand.vmem [shape: f32[4,16], index: 1, kind: input, shape index: {}]   ;;  %s876_s2 = inlined_call_operand.vmem [shape: f32[16,4], index: 2, kind: input, shape index: {}]   ;;  %s877_s3 = inlined_call_operand.vmem [shape: f32[2,16,1], index: 3, kind: output, shape index: {}]  }
   0x1   :  { %10 = vsyncpa [#allocation4 + $0x1], 0  ;;  %s708_s12 = smov 0   ;;  %s710_s13 = smov 0  }
   0x2   :  { %s712_s14 = smov 0   ;;  %s714_s15 = smov 0  }
   0x3   :  { %s716_s16 = smov 0   ;;  %s718_s17 = smov 0  }
   0x4   :  { %s720_s18 = smov 0   ;;  %s722_s19 = smov 0  }
   0x5 LB: > { %s481_s20 = sadd.s32 4294967295, %s682_s19   ;;  %s25_s21 = sadd.s32 1, %s674_s17  ;;  %s682_s19 = sphi %s722_s19, %s16_s19   ;;  %s678_s18 = sphi %s720_s18, %s889_s18   ;;  %s674_s17 = sphi %s718_s17, %s888_s17   ;;  %s670_s16 = sphi %s716_s16, %s887_s16   ;;  %s666_s15 = sphi %s714_s15, %s886_s15   ;;  %s662_s14 = sphi %s712_s14, %s885_s14   ;;  %s658_s13 = sphi %s710_s13, %s884_s13   ;;  %s654_s12 = sphi %s708_s12, %s883_s12  }
   0x6   : > { %p26_p0 = scmp.ge.s32.totalorder %s25_s21, 2  ;;  %s28_s22 = sadd.s32 1, %s678_s18 }
   0x7   : > { %s37_s23 = sadd.s32 1, %s662_s14  ;;  %p44_p1 = scmp.ne.s32.totalorder %s662_s14, %s658_s13 }
   0x8   : > { %s891_s21 = smov (%p26_p0, %s25_s21), 0  ;;  %s893_s22 = smov (!%p26_p0, %s28_s22), %s678_s18 }
   0x9   : > { %s33_s24 = ssub.s32 %s674_s17, %s891_s21  ;;  %p45_p2 = scmp.eq.s32.totalorder %s682_s19, 0 }
   0xa   : > { %p30_p3 = scmp.ge.s32.totalorder %s893_s22, 2  ;;  %p50_p4 = scmp.ne.s32.totalorder %s658_s13, %s654_s12 }
   0xb   : > { %p759_p5 = por %p45_p2, %p44_p1  ;;  %p51_p6 = scmp.eq.s32.totalorder %s481_s20, 0 }
   0xc   : > { %s895_s22 = smov (%p30_p3, %s893_s22), 0  ;;  %p509_p8 = scmp.lt.s32.totalorder %s682_s19, 4 }
   0xd   : > { %880 = sst [smem:[#allocation6_spill]] %s895_s22  ;;  %p765_p7 = por %p51_p6, %p50_p4 }
   0xe   : > { %s32_s27 = ssub.s32 %s678_s18, %s895_s22  ;;  %s148_s29 = sand.u32 1, %s662_s14  }
   0xf   : > { %s34_s28 = sor.u32 %s33_s24, %s32_s27  ;;  %s485_s30 = sshll.u32 %s148_s29, 8 }
  0x10   : > { %p35_p9 = scmp.eq.s32.totalorder %s34_s28, 0  ;;  %s486_s4 = sshll.u32 %s674_s17, 4 }
  0x11   : > { %s487_s6 = sshll.u32 %s678_s18, 6  ;;  %s152_s8 = scalar_lea.vmem [#allocation3], %s485_s30 }
  0x12   : > { %s775_s5 = scalar_select %p35_p9, %s662_s14, %s37_s23  }
  0x13   : > { %s157_s7 = sadd.s32 %s487_s6, %s486_s4  ;;  %s162_s9 = sshll.u32 %s152_s8, 4  ;;  %s163_s9 = int_to_ptr.vmem [resolvable:$true] %s162_s9 }
  0x14   : > { %s488_s10 = sshll.u32 %s157_s7, 3  ;;  %p506_p10 = pnand %p509_p8, %p759_p5 }
  0x15   : > { %s159_s20 = scalar_lea.hbm %s874_s0, %s488_s10  ;;  %s149_s27 = scalar_lea.sflag [#allocation4], %s148_s29 }
  0x16   : > { %s160_s24 = sshll.u32 %s159_s20, 4  ;;  %s684_s23 = smov 4096   ;;  %s161_s24 = int_to_ptr.hbm [resolvable:$true] %s160_s24 }
  0x17   : > { %s685_s28 = smov 2048   ;;  %s686_s22 = smov 128  }
  0x18   : > { %508 = dma.hbm_to_vmem [thread:$0]  (!%p506_p10), %s161_s24, 4096, %s163_s9, %s149_s27, %s684_s23, %s685_s28, %s686_s22  }
  0x19   : > { %p489_p11 = scmp.ge.s32.totalorder %s682_s19, 1  ;;  %p170_p12 = scmp.lt.s32.totalorder %s682_s19, 5 }
  0x1b   : > { %p171_p13 = pnand %p489_p11, %p170_p12 }
  0x1c   : > { %s176_s30 = sand.u32 (!%p171_p13), 1, %s658_s13  }
  0x1d   : > { %174 = sbr.rel (%p171_p13) target bundleno = 507 (0x1fb), region = 32  ;;  %s490_s4 = sshll.u32 (!%p171_p13), %s176_s30, 8 }
  0x1e   : > { %s177_s6 = scalar_lea.sflag (!%p171_p13), [#allocation4], %s176_s30  ;;  %s788_s7 = scalar_lea.vmem (!%p171_p13), [#allocation3], %s490_s4 }
  0x22   : > { %649 = dma.done.wait (%p765_p7), %s177_s6, 4096  }
  0x23   : > { %651 = vsyncadd (%p765_p7), %s177_s6, 4294963200  ;;  %p205_p0 = scmp.lt.s32.totalorder %s670_s16, 1  ;;  %p493_p1 = scmp.ne.s32.totalorder %s666_s15, 0 }
  0x25   : > { %s897_s16 = smov (!%p205_p0, %s670_s16), 1  ;;  %213 = sbr.rel (%p493_p1) target bundleno = 45 (0x2d), region = 40 }
  0x26   : > { %s501_s22 = sshll.u32 %s897_s16, 4 }
  0x27   : > { %s799_s8 = scalar_lea.vmem %s877_s3, %s501_s22 }
  0x2a   : > { %vm214_vm0 = vcmask 7168   ;;  %v687_v0 = vmov 0.0  }
  0x2b   : > { %215 = vst.msk [vmem:[#allocation2] sm:$0xff] %vm214_vm0, %v687_v0 }
  0x2c   : > { %216 = vst.msk [vmem:[#allocation2 + $0x8] sm:$0xff] %vm214_vm0, %v687_v0 }
  0x2d PF: > { %v217_v1 = vld [vmem:[%s788_s7] sm:$0xff]  ;;  %v218_v2 = vld [vmem:[%s788_s7 + $0x8] sm:$0xff]  ;;  %v219_v3 = vld [vmem:[%s788_s7 + $0x10] sm:$0xff]  ;;  %vm287_vm1 = vcmask 7168   ;;  %p494_p2 = scmp.ne.s32.totalorder %s666_s15, 1 }
  0x2e   : > { %v251_v4 = vadd.f32 %v218_v2, %v217_v1  ;;  %v220_v5 = vld [vmem:[%s788_s7 + $0x18] sm:$0xff]  ;;  %v221_v7 = vld [vmem:[%s788_s7 + $0x20] sm:$0xff]  ;;  %v234_v10 = vld [vmem:[%s788_s7 + $0x88] sm:$0xff] }
  0x2f   : > { %v233_v9 = vld [vmem:[%s788_s7 + $0x80] sm:$0xff]  ;;  %v222_v11 = vld [vmem:[%s788_s7 + $0x28] sm:$0xff]  ;;  %v235_v12 = vld [vmem:[%s788_s7 + $0x90] sm:$0xff] }
  0x30   : > { %v252_v6 = vadd.f32 %v251_v4, %v219_v3  ;;  %v268_v13 = vadd.f32 %v234_v10, %v233_v9  ;;  %v236_v15 = vld [vmem:[%s788_s7 + $0x98] sm:$0xff]  ;;  %v223_v16 = vld [vmem:[%s788_s7 + $0x30] sm:$0xff]  ;;  %v237_v19 = vld [vmem:[%s788_s7 + $0xa0] sm:$0xff] }
  0x31   : > { %v224_v20 = vld [vmem:[%s788_s7 + $0x38] sm:$0xff]  ;;  %v238_v23 = vld [vmem:[%s788_s7 + $0xa8] sm:$0xff]  ;;  %v225_v24 = vld [vmem:[%s788_s7 + $0x40] sm:$0xff] }
  0x32   : > { %v253_v8 = vadd.f32 %v252_v6, %v220_v5  ;;  %v269_v17 = vadd.f32 %v268_v13, %v235_v12  ;;  %v239_v27 = vld [vmem:[%s788_s7 + $0xb0] sm:$0xff]  ;;  %v226_v28 = vld [vmem:[%s788_s7 + $0x48] sm:$0xff]  ;;  %v240_v31 = vld [vmem:[%s788_s7 + $0xb8] sm:$0xff] }
  0x33   : > { %v227_v32 = vld [vmem:[%s788_s7 + $0x50] sm:$0xff]  ;;  %v241_v35 = vld [vmem:[%s788_s7 + $0xc0] sm:$0xff]  ;;  %v228_v36 = vld [vmem:[%s788_s7 + $0x58] sm:$0xff] }
  0x34   : > { %v254_v14 = vadd.f32 %v253_v8, %v221_v7  ;;  %v270_v21 = vadd.f32 %v269_v17, %v236_v15  ;;  %v242_v39 = vld [vmem:[%s788_s7 + $0xc8] sm:$0xff]  ;;  %v229_v40 = vld [vmem:[%s788_s7 + $0x60] sm:$0xff]  ;;  %v243_v43 = vld [vmem:[%s788_s7 + $0xd0] sm:$0xff] }
  0x35   : > { %v230_v44 = vld [vmem:[%s788_s7 + $0x68] sm:$0xff]  ;;  %v244_v47 = vld [vmem:[%s788_s7 + $0xd8] sm:$0xff]  ;;  %v231_v48 = vld [vmem:[%s788_s7 + $0x70] sm:$0xff] }
  0x36   : > { %v255_v18 = vadd.f32 %v254_v14, %v222_v11  ;;  %v271_v25 = vadd.f32 %v270_v21, %v237_v19  ;;  %v245_v51 = vld [vmem:[%s788_s7 + $0xe0] sm:$0xff]  ;;  %v232_v52 = vld [vmem:[%s788_s7 + $0x78] sm:$0xff]  ;;  %v246_v55 = vld [vmem:[%s788_s7 + $0xe8] sm:$0xff] }
  0x37   : > { %v247_v58 = vld [vmem:[%s788_s7 + $0xf0] sm:$0xff]  ;;  %v248_v60 = vld [vmem:[%s788_s7 + $0xf8] sm:$0xff] }
  0x38   : > { %v256_v22 = vadd.f32 %v255_v18, %v223_v16  ;;  %v272_v29 = vadd.f32 %v271_v25, %v238_v23  ;;  %v249_v63 = vld [vmem:[#allocation2] sm:$0xff]  ;;  %v250_v2 = vld [vmem:[#allocation2 + $0x8] sm:$0xff] }
  0x3a   : > { %v257_v26 = vadd.f32 %v256_v22, %v224_v20  ;;  %v273_v33 = vadd.f32 %v272_v29, %v239_v27 }
  0x3c   : > { %v258_v30 = vadd.f32 %v257_v26, %v225_v24  ;;  %v274_v37 = vadd.f32 %v273_v33, %v240_v31 }
  0x3e   : > { %v259_v34 = vadd.f32 %v258_v30, %v226_v28  ;;  %v275_v41 = vadd.f32 %v274_v37, %v241_v35 }
  0x40   : > { %v260_v38 = vadd.f32 %v259_v34, %v227_v32  ;;  %v276_v45 = vadd.f32 %v275_v41, %v242_v39 }
  0x42   : > { %v261_v42 = vadd.f32 %v260_v38, %v228_v36  ;;  %v277_v49 = vadd.f32 %v276_v45, %v243_v43 }
  0x44   : > { %v262_v46 = vadd.f32 %v261_v42, %v229_v40  ;;  %v278_v53 = vadd.f32 %v277_v49, %v244_v47 }
  0x46   : > { %v263_v50 = vadd.f32 %v262_v46, %v230_v44  ;;  %v279_v56 = vadd.f32 %v278_v53, %v245_v51 }
  0x48   : > { %v264_v54 = vadd.f32 %v263_v50, %v231_v48  ;;  %v280_v59 = vadd.f32 %v279_v56, %v246_v55 }
  0x4a   : > { %v265_v57 = vadd.f32 %v264_v54, %v232_v52  ;;  %v281_v61 = vadd.f32 %v280_v59, %v247_v58 }
  0x4c   : > { %266 = vadd.xlane.f32.xlu0 %v265_v57  ;;  %v282_v62 = vadd.f32 %v281_v61, %v248_v60 }
  0x54   : > { %283 = vadd.xlane.f32.xlu0 %v282_v62 }
  0xbf   : > { %v267_v0 = vpop.xlane.xlu0 %266 }
  0xc0   : > { %v285_v1 = vadd.f32 %v267_v0, %v249_v63 }
  0xc2   : > { %288 = vst.msk [vmem:[#allocation2] sm:$0xff] %vm287_vm1, %v285_v1 }
  0xc6   : > { %293 = sbr.rel (%p494_p2) target bundleno = 507 (0x1fb), region = 44 }
  0xc7   : > { %v284_v3 = vpop.xlane.xlu0 %283 }
  0xc8   : > { %v286_v4 = vadd.f32 %v284_v3, %v250_v2 }
  0xca   : > { %289 = vst.msk [vmem:[#allocation2 + $0x8] sm:$0xff] %vm287_vm1, %v286_v4 }
  0xcb   : > { %v294_v6 = vld [vmem:[#allocation2] sm:$0xff]  ;;  %vm299_vm2 = vcmask 130048   ;;  %vm333_vm3 = vcmask 1043456   ;;  %vm326_vm4 = vcmask 31744   ;;  %v325_v13 = vld [vmem:[%s876_s2 + $0x8] sm:$0xff] }
  0xcc   : > { %v296_v8 = vmul.f32 0.00024414063, %v294_v6  ;;  %v298_v9 = vld [vmem:[%s875_s1] sm:$0xf] }
  0xcd   : > { %v324_v12 = vld [vmem:[%s876_s2] sm:$0xff] }
  0xd1   : > { %v295_v5 = vld [vmem:[#allocation2 + $0x8] sm:$0xff] }
  0xd2   : > { %v297_v7 = vmul.f32 0.00024414063, %v295_v5 }
  0xd4   : > { %317 = vmatpush.msra.mxu0 %v297_v7 }
  0xd6   : > { %318 = vmatpush.msra.mxu0 %v296_v8 }
  0xd7   : > { %495 = vmatmul.msk.f32.vlgmr.msra.gmra.mxu0 %vm299_vm2, %v298_v9 }
 0x154   : > { %v320_v10 = vpop.f32.mrf.mxu0 }
 0x155   : > { %v323_v11 = vmax.f32 %v320_v10, 0.0 }
 0x157   : > { %496 = vmatpush.msk.msra.mxu1 %vm333_vm3, %v323_v11  ;;  %502 = vmatpush.msk.msra.mxu2 %vm333_vm3, %v323_v11 }
 0x158   : > { %497 = vmatmul.msk.f32.vlgmr.msra.gmra.mxu1 %vm326_vm4, %v324_v12  ;;  %498 = vmatmul.msk.f32.vlgmr.msra.gmra.mxu2 %vm326_vm4, %v325_v13 }
 0x1d5   : > { %v354_v14 = vpop.f32.mrf.mxu1 }
 0x1d6   : > { %v360_v15 = vsub.f32 0.0, %v354_v14 }
 0x1d8   : > { %v362_v16 = vmul.f32 1.442695, %v360_v15 }
 0x1da   : > { %578 = vpow2.f32 %v362_v16 }
 0x1db   : > { %v357_v17 = vpop.f32.mrf.mxu2 }
 0x1dc   : > { %v361_v18 = vsub.f32 0.0, %v357_v17 }
 0x1de   : > { %v364_v19 = vmul.f32 1.442695, %v361_v18 }
 0x1e0   : > { %v579_v20 = vpop.eup %578  ;;  %580 = vpow2.f32 %v364_v19 }
 0x1e1   : > { %v366_v21 = vadd.f32 1.0, %v579_v20 }
 0x1e3   : > { %582 = vrcp.f32 %v366_v21  ;;  %v379_v27 = vand.u32 2147483648, %v366_v21  ;;  %vm373_vm5 = vweird.f32 %v366_v21  ;;  %v377_v29 = vand.u32 2147483647, %v366_v21 }
 0x1e5   : > { %v380_v33 = vor.u32 1.1754944e-38, %v379_v27  ;;  %vm378_vm8 = vcmp.eq.f32.partialorder %v377_v29, 8.507059e+37 }
 0x1e6   : > { %v581_v22 = vpop.eup %580 }
 0x1e7   : > { %v367_v23 = vadd.f32 1.0, %v581_v22 }
 0x1e9   : > { %v583_v24 = vpop.eup %582  ;;  %584 = vrcp.f32 %v367_v23  ;;  %v394_v37 = vand.u32 2147483648, %v367_v23  ;;  %v392_v39 = vand.u32 2147483647, %v367_v23  ;;  %vm388_vm10 = vweird.f32 %v367_v23 }
 0x1ea   : > { %v369_v25 = vmul.f32 %v583_v24, %v366_v21  ;;  %vm374_vm6 = vweird.f32 %v583_v24 }
 0x1eb   : > { %vm375_vm7 = vmor %vm373_vm5, %vm374_vm6  ;;  %v395_v41 = vor.u32 1.1754944e-38, %v394_v37  ;;  %vm393_vm12 = vcmp.eq.f32.partialorder %v392_v39, 8.507059e+37 }
 0x1ec   : > { %v370_v26 = vsub.f32 1.0, %v369_v25 }
 0x1ee   : > { %v371_v28 = vmul.f32 %v583_v24, %v370_v26 }
 0x1ef   : > { %v585_v30 = vpop.eup %584 }
 0x1f0   : > { %v372_v31 = vadd.f32 %v583_v24, %v371_v28  ;;  %v384_v32 = vmul.f32 %v585_v30, %v367_v23  ;;  %vm389_vm9 = vweird.f32 %v585_v30 }
 0x1f1   : > { %vm390_vm11 = vmor %vm388_vm10, %vm389_vm9 }
 0x1f2   : > { %v376_v34 = vsel %vm375_vm7, %v583_v24, %v372_v31  ;;  %v385_v35 = vsub.f32 1.0, %v384_v32 }
 0x1f3   : > { %v381_v36 = vsel %vm378_vm8, %v380_v33, %v376_v34 }
 0x1f4   : > { %398 = vst.msk [vmem:[%s799_s8] sm:$0xff] %vm287_vm1, %v381_v36  ;;  %v386_v38 = vmul.f32 %v585_v30, %v385_v35 }
 0x1f6   : > { %v387_v40 = vadd.f32 %v585_v30, %v386_v38 }
 0x1f8   : > { %v391_v42 = vsel %vm390_vm11, %v585_v30, %v387_v40 }
 0x1f9   : > { %v396_v43 = vsel %vm393_vm12, %v395_v41, %v391_v42 }
 0x1fa   : > { %399 = vst.msk [vmem:[%s799_s8 + $0x8] sm:$0xff] %vm287_vm1, %v396_v43 }
 0x1fb PF: > { %s16_s19 = sadd.s32 1, %s682_s19   ;;  %s882_s20 = sld [smem:[#allocation6_spill]] }
 0x1fc   : > { %p13_p3 = scmp.ge.s32.totalorder %s16_s19, 6   ;;  %s883_s12 = smov %s658_s13 }
 0x1fd   : > { %s884_s13 = smov %s662_s14  ;;  %s885_s14 = smov %s775_s5 }
 0x1fe   : > { %s886_s15 = smov %s674_s17  ;;  %s887_s16 = smov %s678_s18 }
 0x1ff   : > { %s888_s17 = smov %s891_s21  ;;  %15 = sbr.rel (!%p13_p3) target bundleno = 5 (0x5), region = 80 }
 0x201   : > { %s889_s18 = smov %s882_s20 }
 0x204   :  { %421 = vsyncpa [#allocation4], 1 }
 0x205   :  { %423 = vsyncpa [#allocation4 + $0x1], 1 }

</bundles_post_ra>
